<compile_context>
chip_gen: v6e
topology: v6e:2x2x1
jax: 0.10.0
libtpu: 0.0.40
codegen_flags: <defaults>
</compile_context>

<pallas_src>
import functools

import jax
import jax.numpy as jnp
import numpy as np
from jax.experimental import pallas as pl
from jax.experimental.pallas import tpu as pltpu


def _upsample_kernel(x_ref, halo_ref, w_ref, b_ref, f_ref, o_ref, win_ref, *,
                     c_out, tile_l):
    # x_ref   : (tile_l, Cin)        current length-tile of x (channels-last)
    # halo_ref: (2, Cin)             [x[s0-1], x[s0+tile_l]] (0 at seq edges)
    # w_ref   : (4, Cin, Cout)       per-tap weights, resident in VMEM
    # b_ref   : (1, Cout)            bias (f32)
    # f_ref   : (2, tile_l, Cf)      feature map, phase-split channels-last
    # o_ref   : (2, tile_l, Cout+Cf) output, phase-split channels-last
    # win_ref : (tile_l + 16, Cin)   VMEM scratch for the halo'd window
    x_cur = x_ref[...]

    # Rebuild the halo'd window in VMEM: x at sublane-aligned offset 8,
    # previous row at 7, next row at 8 + tile_l.
    win_ref[8:8 + tile_l, :] = x_cur
    win_ref[7:8, :] = halo_ref[0:1, :]
    win_ref[8 + tile_l:9 + tile_l, :] = halo_ref[1:2, :]

    x_prv = win_ref[7:7 + tile_l, :]   # x[s-1]
    x_nxt = win_ref[9:9 + tile_l, :]   # x[s+1]
    b = b_ref[...]

    y_even = (jnp.dot(x_cur, w_ref[1], preferred_element_type=jnp.float32)
              + jnp.dot(x_prv, w_ref[3], preferred_element_type=jnp.float32)
              + b)
    y_odd = (jnp.dot(x_nxt, w_ref[0], preferred_element_type=jnp.float32)
             + jnp.dot(x_cur, w_ref[2], preferred_element_type=jnp.float32)
             + b)

    # LeakyReLU(0.1)
    y_even = jnp.where(y_even > 0, y_even, 0.1 * y_even)
    y_odd = jnp.where(y_odd > 0, y_odd, 0.1 * y_odd)

    # Dense per-phase stores (torch.cat((out, feature_map), dim=1) order).
    o_ref[0, :, :c_out] = y_even.astype(o_ref.dtype)   # t = 2s
    o_ref[1, :, :c_out] = y_odd.astype(o_ref.dtype)    # t = 2s + 1
    o_ref[:, :, c_out:] = f_ref[...]                   # feature-map passthrough


def _round_up(v, m):
    return ((v + m - 1) // m) * m


def _pick_tile_l(length, target, footprint, budget):
    """Largest multiple-of-8 divisor of `length` (or `length` itself) that is
    <= target and whose padded VMEM footprint fits the budget."""
    cands = [d for d in range(8, length + 1, 8) if length % d == 0]
    if not cands or cands[-1] != length:
        cands.append(length)         # a full-length block is always layout-legal
    best = None
    for d in cands:
        if d <= target and footprint(d) <= budget and (best is None or d > best):
            best = d
    if best is None:
        best = min(cands)
    return best


def upsample(x, feature_map, weight, bias, *, tile_l_target=None):
    """x: (N, Cin, L); feature_map: (N, Cf, 2L); weight: (Cin, Cout, 4);
    bias: (Cout,).  Returns (N, Cout + Cf, 2L), matching the PyTorch module."""
    N, Cin, L = x.shape
    Cout = weight.shape[1]
    Cf = feature_map.shape[1]
    Ctot = Cout + Cf
    dtype = x.dtype
    itemsize = jnp.dtype(dtype).itemsize

    # ---- generation-aware VMEM budget and length tile ----
    try:
        vmem_cap = int(pltpu.get_tpu_info().vmem_capacity_bytes)
    except Exception:
        vmem_cap = 64 * 2 ** 20          # conservative fallback (v7x per-core)
    budget = int(0.70 * vmem_cap)
    if tile_l_target is None:
        # v5e/v6e (128 MiB VMEM): go big; v7x (64 MiB): stay moderate.
        tile_l_target = 1024 if vmem_cap > 96 * 2 ** 20 else 512

    def footprint(tl):
        def buf(r, c, isz=itemsize):
            return _round_up(max(r, 1), 8) * _round_up(max(c, 1), 128) * isz
        streamed = (buf(tl, Cin) + buf(2, Cin)              # x block + halo rows
                    + 2 * buf(tl, Cf) + 2 * buf(tl, Ctot))  # f + out (2 phases)
        resident = 4 * buf(Cin, Cout) + buf(1, Cout, 4)     # taps + bias
        scratch = buf(tl + 16, Cin)                         # halo'd window
        temps = 4 * buf(tl, Cout, 4)                        # f32 accumulators
        return 2 * (streamed + resident) + scratch + temps  # x2: double buffers

    tile_l = _pick_tile_l(L, tile_l_target, footprint, budget)
    num_lt = L // tile_l
    vmem_limit = int(min(budget, max(32 * 2 ** 20, int(1.3 * footprint(tile_l)))))

    # ---- wrapper glue ----
    xt = jnp.transpose(x, (0, 2, 1))                        # (N, L, Cin)

    # Tiny per-tile halo rows [x[s0-1], x[s0+tile_l]] (zero at global edges).
    starts = jnp.arange(num_lt) * tile_l
    prev_rows = jnp.take(xt, jnp.clip(starts - 1, 0, L - 1), axis=1)
    next_rows = jnp.take(xt, jnp.clip(starts + tile_l, 0, L - 1), axis=1)
    prev_rows = jnp.where((starts >= 1)[None, :, None],
                          prev_rows, jnp.zeros_like(prev_rows))
    next_rows = jnp.where((starts + tile_l <= L - 1)[None, :, None],
                          next_rows, jnp.zeros_like(next_rows))
    halo = jnp.stack([prev_rows, next_rows], axis=2).astype(dtype)  # (N,num_lt,2,Cin)

    # Feature map: (N, Cf, 2L) -> phase-split channels-last (N, 2, L, Cf).
    fps = jnp.transpose(feature_map.reshape(N, Cf, L, 2), (0, 3, 2, 1)).astype(dtype)

    # Stacked per-tap weights (one resident DMA) + bias.
    w_taps = jnp.transpose(weight, (2, 0, 1)).astype(dtype)  # (4, Cin, Cout)
    b2 = bias.reshape(1, Cout).astype(jnp.float32)

    kernel = functools.partial(_upsample_kernel, c_out=Cout, tile_l=tile_l)

    out = pl.pallas_call(
        kernel,
        out_shape=jax.ShapeDtypeStruct((N, 2, L, Ctot), dtype),
        grid_spec=pltpu.PrefetchScalarGridSpec(
            num_scalar_prefetch=0,
            grid=(N, num_lt),
            in_specs=[
                pl.BlockSpec((None, tile_l, Cin), lambda n, l: (n, l, 0)),
                pl.BlockSpec((None, None, 2, Cin), lambda n, l: (n, l, 0, 0)),
                pl.BlockSpec((4, Cin, Cout), lambda n, l: (0, 0, 0)),
                pl.BlockSpec((1, Cout), lambda n, l: (0, 0)),
                pl.BlockSpec((None, 2, tile_l, Cf), lambda n, l: (n, 0, l, 0)),
            ],
            out_specs=pl.BlockSpec((None, 2, tile_l, Ctot),
                                   lambda n, l: (n, 0, l, 0)),
            scratch_shapes=[pltpu.VMEM((tile_l + 16, Cin), dtype)],
        ),
        compiler_params=pltpu.CompilerParams(
            dimension_semantics=("parallel", "parallel"),
            vmem_limit_bytes=vmem_limit),
    )(xt, halo, w_taps, b2, fps)

    # (N, 2, L, Ctot) -> (N, Ctot, L, 2) -> (N, Ctot, 2L): the phase interleave
    # is folded into the NCL transpose we have to do anyway.
    return jnp.transpose(out, (0, 3, 2, 1)).reshape(N, Ctot, 2 * L)


def _reference(x, fmap, w, b):
    """Direct NumPy ConvTranspose1d(k=4,s=2,p=1) + LeakyReLU(0.1) + concat."""
    N, Cin, L = x.shape
    Cout, K, stride, pad = w.shape[1], 4, 2, 1
    Lout = (L - 1) * stride - 2 * pad + K
    y = np.zeros((N, Cout, Lout), np.float32)
    for n in range(N):
        for ci in range(Cin):
            for s in range(L):
                for k in range(K):
                    t = s * stride + k - pad
                    if 0 <= t < Lout:
                        y[n, :, t] += x[n, ci, s] * w[ci, :, k]
    y += b[None, :, None]
    y = np.where(y > 0, y, 0.1 * y)
    return np.concatenate([y, fmap], axis=1)


if __name__ == "__main__":
    N, Cin, Cout, Cf, L = 2, 4, 4, 4, 16

    key = jax.random.PRNGKey(0)
    kx, kf, kw, kb = jax.random.split(key, 4)
    x = jax.random.normal(kx, (N, Cin, L), dtype=jnp.float32)
    feature_map = jax.random.normal(kf, (N, Cf, 2 * L), dtype=jnp.float32)
    # ConvTranspose1d weight layout: (C_in, C_out, K).
    weight = 0.1 * jax.random.normal(kw, (Cin, Cout, 4), dtype=jnp.float32)
    bias = 0.1 * jax.random.normal(kb, (Cout,), dtype=jnp.float32)

    fn = jax.jit(upsample)
    out = fn(x, feature_map, weight, bias)
    out = jax.block_until_ready(out)

    ref = _reference(np.asarray(x), np.asarray(feature_map),
                     np.asarray(weight), np.asarray(bias))
    np.testing.assert_allclose(np.asarray(out), ref, rtol=1e-5, atol=1e-5)

    print("KERNEL_OK")
</pallas_src>

<mosaic_0001>
module attributes {stable_mosaic.version = 11 : i64} {
  func.func @_upsample_kernel(%arg0: i32, %arg1: i32, %arg2: memref<1x16x4xf32, #tpu.memory_space<vmem>>, %arg3: memref<1x1x2x4xf32, #tpu.memory_space<vmem>>, %arg4: memref<4x4x4xf32, #tpu.memory_space<vmem>>, %arg5: memref<1x4xf32, #tpu.memory_space<vmem>>, %arg6: memref<1x2x16x4xf32, #tpu.memory_space<vmem>>, %arg7: memref<1x2x16x8xf32, #tpu.memory_space<vmem>>, %arg8: memref<32x4xf32, #tpu.memory_space<vmem>>) attributes {dimension_semantics = [#tpu.dimension_semantics<parallel>, #tpu.dimension_semantics<parallel>], iteration_bounds = array<i64: 2, 1>, scalar_prefetch = 0 : i64, scratch_operands = 1 : i64, tpu.core_type = #tpu.core_type<tc>, window_params = [{transform_indices = @transform_0, window_bounds = array<i64: 1, 16, 4>}, {transform_indices = @transform_1, window_bounds = array<i64: 1, 1, 2, 4>}, {pipeline_mode = #tpu.pipeline_mode<synchronous>, transform_indices = @transform_2, window_bounds = array<i64: 4, 4, 4>}, {pipeline_mode = #tpu.pipeline_mode<synchronous>, transform_indices = @transform_3, window_bounds = array<i64: 1, 4>}, {transform_indices = @transform_4, window_bounds = array<i64: 1, 2, 16, 4>}, {transform_indices = @transform_5, window_bounds = array<i64: 1, 2, 16, 8>}]} {
    %c0 = arith.constant 0 : index
    %c0_0 = arith.constant 0 : index
    %c0_1 = arith.constant 0 : index
    %0 = vector.load %arg2[%c0, %c0_0, %c0_1] : memref<1x16x4xf32, #tpu.memory_space<vmem>>, vector<1x16x4xf32>
    %1 = vector.shape_cast %0 : vector<1x16x4xf32> to vector<16x4xf32>
    %c8 = arith.constant 8 : index
    %c0_2 = arith.constant 0 : index
    %2 = vector.load %arg8[%c8, %c0_2] : memref<32x4xf32, #tpu.memory_space<vmem>>, vector<16x4xf32>
    tpu.vector_store %arg8[%c8, %c0_2], %1 {strides = array<i32>} : memref<32x4xf32, #tpu.memory_space<vmem>>, vector<16x4xf32>,
    %c0_3 = arith.constant 0 : index
    %c0_4 = arith.constant 0 : index
    %c0_5 = arith.constant 0 : index
    %c0_6 = arith.constant 0 : index
    %3 = vector.load %arg3[%c0_3, %c0_4, %c0_5, %c0_6] : memref<1x1x2x4xf32, #tpu.memory_space<vmem>>, vector<1x1x1x4xf32>
    %4 = vector.shape_cast %3 : vector<1x1x1x4xf32> to vector<1x4xf32>
    %c7 = arith.constant 7 : index
    %c0_7 = arith.constant 0 : index
    %5 = vector.load %arg8[%c7, %c0_7] : memref<32x4xf32, #tpu.memory_space<vmem>>, vector<1x4xf32>
    tpu.vector_store %arg8[%c7, %c0_7], %4 {strides = array<i32>} : memref<32x4xf32, #tpu.memory_space<vmem>>, vector<1x4xf32>,
    %c0_8 = arith.constant 0 : index
    %c0_9 = arith.constant 0 : index
    %c1 = arith.constant 1 : index
    %c0_10 = arith.constant 0 : index
    %6 = vector.load %arg3[%c0_8, %c0_9, %c1, %c0_10] : memref<1x1x2x4xf32, #tpu.memory_space<vmem>>, vector<1x1x1x4xf32>
    %7 = vector.shape_cast %6 : vector<1x1x1x4xf32> to vector<1x4xf32>
    %c24 = arith.constant 24 : index
    %c0_11 = arith.constant 0 : index
    %8 = vector.load %arg8[%c24, %c0_11] : memref<32x4xf32, #tpu.memory_space<vmem>>, vector<1x4xf32>
    tpu.vector_store %arg8[%c24, %c0_11], %7 {strides = array<i32>} : memref<32x4xf32, #tpu.memory_space<vmem>>, vector<1x4xf32>,
    %c7_12 = arith.constant 7 : index
    %c0_13 = arith.constant 0 : index
    %9 = vector.load %arg8[%c7_12, %c0_13] : memref<32x4xf32, #tpu.memory_space<vmem>>, vector<16x4xf32>
    %c9 = arith.constant 9 : index
    %c0_14 = arith.constant 0 : index
    %10 = vector.load %arg8[%c9, %c0_14] : memref<32x4xf32, #tpu.memory_space<vmem>>, vector<16x4xf32>
    %c0_15 = arith.constant 0 : index
    %c0_16 = arith.constant 0 : index
    %11 = vector.load %arg5[%c0_15, %c0_16] : memref<1x4xf32, #tpu.memory_space<vmem>>, vector<1x4xf32>
    %c1_17 = arith.constant 1 : index
    %c0_18 = arith.constant 0 : index
    %c0_19 = arith.constant 0 : index
    %12 = vector.load %arg4[%c1_17, %c0_18, %c0_19] : memref<4x4x4xf32, #tpu.memory_space<vmem>>, vector<1x4x4xf32>
    %13 = vector.shape_cast %12 : vector<1x4x4xf32> to vector<4x4xf32>
    %cst = arith.constant dense<0.000000e+00> : vector<16x4xf32>
    %14 = tpu.matmul %1, %13, %cst {dimension_numbers = #tpu.dot_dimension_numbers<[1], [0], [0], [1], [0, 0, 1, 1], [], []>} : vector<16x4xf32>, vector<4x4xf32>, vector<16x4xf32> -> vector<16x4xf32>
    %c3 = arith.constant 3 : index
    %c0_20 = arith.constant 0 : index
    %c0_21 = arith.constant 0 : index
    %15 = vector.load %arg4[%c3, %c0_20, %c0_21] : memref<4x4x4xf32, #tpu.memory_space<vmem>>, vector<1x4x4xf32>
    %16 = vector.shape_cast %15 : vector<1x4x4xf32> to vector<4x4xf32>
    %cst_22 = arith.constant dense<0.000000e+00> : vector<16x4xf32>
    %17 = tpu.matmul %9, %16, %cst_22 {dimension_numbers = #tpu.dot_dimension_numbers<[1], [0], [0], [1], [0, 0, 1, 1], [], []>} : vector<16x4xf32>, vector<4x4xf32>, vector<16x4xf32> -> vector<16x4xf32>
    %18 = arith.addf %14, %17 : vector<16x4xf32>
    %19 = vector.broadcast %11 : vector<1x4xf32> to vector<16x4xf32>
    %20 = arith.addf %18, %19 : vector<16x4xf32>
    %c0_23 = arith.constant 0 : index
    %c0_24 = arith.constant 0 : index
    %c0_25 = arith.constant 0 : index
    %21 = vector.load %arg4[%c0_23, %c0_24, %c0_25] : memref<4x4x4xf32, #tpu.memory_space<vmem>>, vector<1x4x4xf32>
    %22 = vector.shape_cast %21 : vector<1x4x4xf32> to vector<4x4xf32>
    %cst_26 = arith.constant dense<0.000000e+00> : vector<16x4xf32>
    %23 = tpu.matmul %10, %22, %cst_26 {dimension_numbers = #tpu.dot_dimension_numbers<[1], [0], [0], [1], [0, 0, 1, 1], [], []>} : vector<16x4xf32>, vector<4x4xf32>, vector<16x4xf32> -> vector<16x4xf32>
    %c2 = arith.constant 2 : index
    %c0_27 = arith.constant 0 : index
    %c0_28 = arith.constant 0 : index
    %24 = vector.load %arg4[%c2, %c0_27, %c0_28] : memref<4x4x4xf32, #tpu.memory_space<vmem>>, vector<1x4x4xf32>
    %25 = vector.shape_cast %24 : vector<1x4x4xf32> to vector<4x4xf32>
    %cst_29 = arith.constant dense<0.000000e+00> : vector<16x4xf32>
    %26 = tpu.matmul %1, %25, %cst_29 {dimension_numbers = #tpu.dot_dimension_numbers<[1], [0], [0], [1], [0, 0, 1, 1], [], []>} : vector<16x4xf32>, vector<4x4xf32>, vector<16x4xf32> -> vector<16x4xf32>
    %27 = arith.addf %23, %26 : vector<16x4xf32>
    %28 = vector.broadcast %11 : vector<1x4xf32> to vector<16x4xf32>
    %29 = arith.addf %27, %28 : vector<16x4xf32>
    %cst_30 = arith.constant 0.000000e+00 : f32
    %30 = vector.broadcast %cst_30 : f32 to vector<16x4xf32>
    %31 = arith.cmpf ogt, %20, %30 : vector<16x4xf32>
    %cst_31 = arith.constant 1.000000e-01 : f32
    %32 = vector.broadcast %cst_31 : f32 to vector<16x4xf32>
    %33 = arith.mulf %32, %20 : vector<16x4xf32>
    %34 = arith.select %31, %20, %33 : vector<16x4xi1>, vector<16x4xf32>
    %cst_32 = arith.constant 0.000000e+00 : f32
    %35 = vector.broadcast %cst_32 : f32 to vector<16x4xf32>
    %36 = arith.cmpf ogt, %29, %35 : vector<16x4xf32>
    %cst_33 = arith.constant 1.000000e-01 : f32
    %37 = vector.broadcast %cst_33 : f32 to vector<16x4xf32>
    %38 = arith.mulf %37, %29 : vector<16x4xf32>
    %39 = arith.select %36, %29, %38 : vector<16x4xi1>, vector<16x4xf32>
    %c0_34 = arith.constant 0 : index
    %c0_35 = arith.constant 0 : index
    %c0_36 = arith.constant 0 : index
    %c0_37 = arith.constant 0 : index
    %40 = vector.load %arg7[%c0_34, %c0_35, %c0_36, %c0_37] : memref<1x2x16x8xf32, #tpu.memory_space<vmem>>, vector<1x1x16x4xf32>
    %41 = vector.shape_cast %40 : vector<1x1x16x4xf32> to vector<16x4xf32>
    %42 = vector.shape_cast %34 : vector<16x4xf32> to vector<1x1x16x4xf32>
    tpu.vector_store %arg7[%c0_34, %c0_35, %c0_36, %c0_37], %42 {strides = array<i32>} : memref<1x2x16x8xf32, #tpu.memory_space<vmem>>, vector<1x1x16x4xf32>,
    %c0_38 = arith.constant 0 : index
    %c1_39 = arith.constant 1 : index
    %c0_40 = arith.constant 0 : index
    %c0_41 = arith.constant 0 : index
    %43 = vector.load %arg7[%c0_38, %c1_39, %c0_40, %c0_41] : memref<1x2x16x8xf32, #tpu.memory_space<vmem>>, vector<1x1x16x4xf32>
    %44 = vector.shape_cast %43 : vector<1x1x16x4xf32> to vector<16x4xf32>
    %45 = vector.shape_cast %39 : vector<16x4xf32> to vector<1x1x16x4xf32>
    tpu.vector_store %arg7[%c0_38, %c1_39, %c0_40, %c0_41], %45 {strides = array<i32>} : memref<1x2x16x8xf32, #tpu.memory_space<vmem>>, vector<1x1x16x4xf32>,
    %c0_42 = arith.constant 0 : index
    %c0_43 = arith.constant 0 : index
    %c0_44 = arith.constant 0 : index
    %c0_45 = arith.constant 0 : index
    %46 = vector.load %arg6[%c0_42, %c0_43, %c0_44, %c0_45] : memref<1x2x16x4xf32, #tpu.memory_space<vmem>>, vector<1x2x16x4xf32>
    %47 = vector.shape_cast %46 : vector<1x2x16x4xf32> to vector<2x16x4xf32>
    %c0_46 = arith.constant 0 : index
    %c0_47 = arith.constant 0 : index
    %c0_48 = arith.constant 0 : index
    %c4 = arith.constant 4 : index
    %48 = vector.load %arg7[%c0_46, %c0_47, %c0_48, %c4] : memref<1x2x16x8xf32, #tpu.memory_space<vmem>>, vector<1x2x16x4xf32>
    %49 = vector.shape_cast %48 : vector<1x2x16x4xf32> to vector<2x16x4xf32>
    %50 = vector.shape_cast %47 : vector<2x16x4xf32> to vector<1x2x16x4xf32>
    tpu.vector_store %arg7[%c0_46, %c0_47, %c0_48, %c4], %50 {strides = array<i32>} : memref<1x2x16x8xf32, #tpu.memory_space<vmem>>, vector<1x2x16x4xf32>,
    return
  }
  func.func @transform_0(%arg0: i32, %arg1: i32) -> (i32, i32, i32) {
    %c0_i32 = arith.constant 0 : i32
    %c0_i32_0 = arith.constant 0 : i32
    return %arg0, %arg1, %c0_i32 : i32, i32, i32
  }
  func.func @transform_1(%arg0: i32, %arg1: i32) -> (i32, i32, i32, i32) {
    %c0_i32 = arith.constant 0 : i32
    %c0_i32_0 = arith.constant 0 : i32
    %c0_i32_1 = arith.constant 0 : i32
    return %arg0, %arg1, %c0_i32, %c0_i32_0 : i32, i32, i32, i32
  }
  func.func @transform_2(%arg0: i32, %arg1: i32) -> (i32, i32, i32) {
    %c0_i32 = arith.constant 0 : i32
    %c0_i32_0 = arith.constant 0 : i32
    %c0_i32_1 = arith.constant 0 : i32
    %c0_i32_2 = arith.constant 0 : i32
    return %c0_i32, %c0_i32_0, %c0_i32_1 : i32, i32, i32
  }
  func.func @transform_3(%arg0: i32, %arg1: i32) -> (i32, i32) {
    %c0_i32 = arith.constant 0 : i32
    %c0_i32_0 = arith.constant 0 : i32
    %c0_i32_1 = arith.constant 0 : i32
    return %c0_i32, %c0_i32_0 : i32, i32
  }
  func.func @transform_4(%arg0: i32, %arg1: i32) -> (i32, i32, i32, i32) {
    %c0_i32 = arith.constant 0 : i32
    %c0_i32_0 = arith.constant 0 : i32
    %c0_i32_1 = arith.constant 0 : i32
    return %arg0, %c0_i32, %arg1, %c0_i32_0 : i32, i32, i32, i32
  }
  func.func @transform_5(%arg0: i32, %arg1: i32) -> (i32, i32, i32, i32) {
    %c0_i32 = arith.constant 0 : i32
    %c0_i32_0 = arith.constant 0 : i32
    %c0_i32_1 = arith.constant 0 : i32
    return %arg0, %c0_i32, %arg1, %c0_i32_0 : i32, i32, i32, i32
  }
}

</mosaic_0001>

<bundles_post_ra>
// kernel: upsample.1
= control target key start
LH: loop header
LB: loop body
LE: loop exit
PB: predicated region body
PF: predicated region fallthrough
CT: control target
= control target key end

     0   :  { %s1000_s18 = smov 0   ;;  %s1002_s19 = smov 0   ;;  %s1089_s0 = inlined_call_operand.vmem [shape: f32[2,16,4], index: 0, kind: input, shape index: {}]   ;;  %s1090_s1 = inlined_call_operand.vmem [shape: f32[2,1,2,4], index: 1, kind: input, shape index: {}]   ;;  %s1091_s2 = inlined_call_operand.vmem [shape: f32[4,4,4], index: 2, kind: input, shape index: {}]   ;;  %s1092_s3 = inlined_call_operand.vmem [shape: f32[1,4], index: 3, kind: input, shape index: {}]   ;;  %s1093_s4 = inlined_call_operand.vmem [shape: f32[2,2,16,4], index: 4, kind: input, shape index: {}]   ;;  %s1094_s5 = inlined_call_operand.vmem [shape: f32[2,2,16,8], index: 5, kind: output, shape index: {}]  }
   0x1   :  { %s1004_s20 = smov 0  }
   0x2 LB: > { %s27_s21 = sadd.s32 1, %s963_s19  ;;  %p857_p0 = scmp.ge.s32.totalorder %s967_s20, 1  ;;  %s967_s20 = sphi %s1004_s20, %s15_s20   ;;  %s963_s19 = sphi %s1002_s19, %s1096_s19   ;;  %s959_s18 = sphi %s1000_s18, %s1095_s18  }
   0x3   : > { %p29_p1 = scmp.ge.s32.totalorder %s27_s21, 2  ;;  %p239_p2 = scmp.lt.s32.totalorder %s967_s20, 3 }
   0x5   : > { %s1098_s21 = smov (%p29_p1, %s27_s21), 0  ;;  %p240_p3 = pnand %p857_p0, %p239_p2 }
   0x6   : > { %p292_p4 = scmp.lt.s32.totalorder (!%p240_p3), %s959_s18, 1  ;;  %s969_s17 = smov (!%p240_p3), 4  }
   0x7   : > { %243 = sbr.rel (%p240_p3) target bundleno = 235 (0xeb), region = 40 }
   0xc   : > { %v865_v0 = vld [vmem:[%s1091_s2 + $0x4] sm:$0xf]  ;;  %vm353_vm0 = vcmask 1043456   ;;  %v866_v1 = vld [vmem:[%s1091_s2 + $0xc] sm:$0xf]  ;;  %s1100_s18 = smov (!%p292_p4, %s959_s18), 1 }
   0xd   : > { %905 = vmatprep.subr.msk.mxu1 %vm353_vm0, %v865_v0  ;;  %900 = vmatprep.subr.msk.mxu0 %vm353_vm0, %v866_v1  ;;  %v874_v2 = vld [vmem:[%s1091_s2 + $0x8] sm:$0xf]  ;;  %v524_v3 = vld [vmem:[%s1091_s2] sm:$0xf]  ;;  %s885_s30 = sshll.u32 %s1100_s18, 4  ;;  %s860_s6 = sshll.u32 %s1100_s18, 1 }
   0xe   : > { %906 = vmatpush3.msk.msra.mxu1 %vm353_vm0, %v865_v0  ;;  %901 = vmatpush3.msk.msra.mxu0 %vm353_vm0, %v866_v1  ;;  %vm330_vm1 = vcmask 31744   ;;  %vm334_vm2 = vcmask 24576   ;;  %s299_s9 = scalar_lea.vmem %s1089_s0, %s885_s30  ;;  %s307_s12 = scalar_lea.vmem %s1090_s1, %s860_s6  ;;  %v873_v18 = vld [vmem:[%s1092_s3] ss:$0 sm:$0xff]  ;;  %vm728_vm5 = vcmask 64544  }
   0xf   : > { %910 = vmatprep.subr.msk.mxu0 %vm353_vm0, %v874_v2  ;;  %915 = vmatprep.subr.msk.mxu1 %vm353_vm0, %v524_v3  ;;  %v328_v4 = vld [vmem:[%s299_s9] sm:$0xff]  ;;  %s886_s13 = sshll.u32 %s1100_s18, 5  ;;  %v329_v7 = vld [vmem:[%s299_s9 + $0x8] sm:$0xff] }
  0x10   : > { %v333_v5 = vld [vmem:[%s307_s12] sm:$0x1]  ;;  %v336_v6 = vld [vmem:[%s307_s12 + $0x1] sm:$0x1]  ;;  %331 = vst.msk [vmem:[#allocation2 + $0x8] sm:$0xff] %vm330_vm1, %v328_v4  ;;  %907 = vmatprep.mubr.msk.f32.mxu1 %vm330_vm1, %v328_v4  ;;  %s316_s16 = scalar_lea.vmem %s1093_s4, %s886_s13  ;;  %332 = vst.msk [vmem:[#allocation2 + $0x10] sm:$0xff] %vm330_vm1, %v329_v7  ;;  %s326_s26 = scalar_lea.vmem %s1094_s5, %s886_s13 }
  0x11   : > { %335 = vst.msk [vmem:[#allocation2 + $0x7] sm:$0x1] %vm334_vm2, %v333_v5  ;;  %337 = vst.msk [vmem:[#allocation2 + $0x18] sm:$0x1] %vm334_vm2, %v336_v6  ;;  %908 = vmatmul.mubr.msk.f32.vlgmr.msra.gmra.mxu1 %vm330_vm1, %v329_v7  ;;  %v710_v8 = vld [vmem:[%s316_s16 + $0x10] sm:$0xff]  ;;  %v708_v9 = vld [vmem:[%s316_s16] sm:$0xff] }
  0x12   : > { %916 = vmatpush3.msk.msra.mxu1 %vm353_vm0, %v524_v3  ;;  %720 = vrot.lane.b32.xlu1 %v710_v8, %s969_s17  ;;  %v711_v10 = vld [vmem:[%s316_s16 + $0x18] sm:$0xff]  ;;  %v709_v11 = vld [vmem:[%s316_s16 + $0x8] sm:$0xff] }
  0x13   : > { %716 = vrot.lane.b32.xlu0 %v708_v9, %s969_s17 }
  0x16   : > { %722 = vrot.lane.b32.xlu1 %v711_v10, %s969_s17 }
  0x17   : > { %718 = vrot.lane.b32.xlu0 %v709_v11, %s969_s17  ;;  %v339_v13 = vld [vmem:[#allocation2 + $0xf] sm:$0xff] }
  0x18   : > { %v338_v12 = vld [vmem:[#allocation2 + $0x7] sm:$0xff]  ;;  %v341_v15 = vld [vmem:[#allocation2 + $0x11] sm:$0xff] }
  0x19   : > { %902 = vmatprep.mubr.msk.f32.mxu0 %vm330_vm1, %v338_v12  ;;  %v340_v14 = vld [vmem:[#allocation2 + $0x9] sm:$0xff] }
  0x1a   : > { %903 = vmatmul.mubr.msk.f32.vlgmr.msra.gmra.mxu0 %vm330_vm1, %v339_v13  ;;  %917 = vmatprep.mubr.msk.f32.mxu1 %vm330_vm1, %v340_v14 }
  0x1b   : > { %911 = vmatpush3.msk.msra.mxu0 %vm353_vm0, %v874_v2  ;;  %918 = vmatmul.mubr.msk.f32.vlgmr.msra.gmra.mxu1 %vm330_vm1, %v341_v15 }
  0x1c   : > { %912 = vmatprep.mubr.msk.f32.mxu0 %vm330_vm1, %v328_v4 }
  0x1e   : > { %913 = vmatmul.mubr.msk.f32.vlgmr.msra.gmra.mxu0 %vm330_vm1, %v329_v7 }
  0x84   : > { %v721_v27 = vpop.permute.xlu1 %720 }
  0x85   : > { %v717_v20 = vpop.permute.xlu0 %716 }
  0x88   : > { %v723_v41 = vpop.permute.xlu1 %722 }
  0x89   : > { %v719_v32 = vpop.permute.xlu0 %718 }
  0xd1   : > { %v909_v16 = vpop.f32.mrf.mxu1 }
  0xd3   : > { %v507_v17 = vpop.f32.mrf.mxu1 }
  0xda   : > { %v904_v19 = vpop.f32.mrf.mxu0 }
  0xdb   : > { %v513_v21 = vadd.f32 %v909_v16, %v904_v19  ;;  %v919_v25 = vpop.f32.mrf.mxu1 }
  0xdc   : > { %v423_v22 = vpop.f32.mrf.mxu0 }
  0xdd   : > { %v523_v23 = vadd.f32 %v873_v18, %v513_v21  ;;  %v508_v24 = vadd.f32 %v507_v17, %v423_v22  ;;  %v680_v36 = vpop.f32.mrf.mxu1 }
  0xde   : > { %v914_v26 = vpop.f32.mrf.mxu0 }
  0xdf   : > { %vm692_vm3 = vcmp.gt.f32.partialorder %v523_v23, 0.0  ;;  %v694_v28 = vmul.f32 0.1, %v523_v23  ;;  %v522_v29 = vadd.f32 %v873_v18, %v508_v24  ;;  %v686_v30 = vadd.f32 %v919_v25, %v914_v26 }
  0xe0   : > { %v596_v31 = vpop.f32.mrf.mxu0 }
  0xe1   : > { %v696_v33 = vsel %vm692_vm3, %v523_v23, %v694_v28  ;;  %vm691_vm4 = vcmp.gt.f32.partialorder %v522_v29, 0.0  ;;  %v693_v34 = vmul.f32 0.1, %v522_v29  ;;  %v690_v35 = vadd.f32 %v873_v18, %v686_v30 }
  0xe2   : > { %704 = vst.msk [vmem:[%s326_s26 + $0x8] sm:$0xff] %vm330_vm1, %v696_v33  ;;  %v681_v37 = vadd.f32 %v680_v36, %v596_v31 }
  0xe3   : > { %v695_v38 = vsel %vm691_vm4, %v522_v29, %v693_v34  ;;  %vm698_vm6 = vcmp.gt.f32.partialorder %v690_v35, 0.0  ;;  %v700_v39 = vmul.f32 0.1, %v690_v35  ;;  %730 = vst.msk [vmem:[%s326_s26 + $0x8] sm:$0xff] %vm728_vm5, %v719_v32 }
  0xe4   : > { %703 = vst.msk [vmem:[%s326_s26] sm:$0xff] %vm330_vm1, %v695_v38  ;;  %v689_v40 = vadd.f32 %v873_v18, %v681_v37 }
  0xe5   : > { %v702_v42 = vsel %vm698_vm6, %v690_v35, %v700_v39  ;;  %729 = vst.msk [vmem:[%s326_s26] sm:$0xff] %vm728_vm5, %v717_v20 }
  0xe6   : > { %882 = vst.msk [vmem:[%s326_s26 + $0x18] sm:$0xff] %vm330_vm1, %v702_v42  ;;  %vm697_vm7 = vcmp.gt.f32.partialorder %v689_v40, 0.0  ;;  %v699_v43 = vmul.f32 0.1, %v689_v40 }
  0xe7   : > { %732 = vst.msk [vmem:[%s326_s26 + $0x18] sm:$0xff] %vm728_vm5, %v723_v41 }
  0xe8   : > { %v701_v44 = vsel %vm697_vm7, %v689_v40, %v699_v43 }
  0xe9   : > { %881 = vst.msk [vmem:[%s326_s26 + $0x10] sm:$0xff] %vm330_vm1, %v701_v44 }
  0xea   : > { %731 = vst.msk [vmem:[%s326_s26 + $0x10] sm:$0xff] %vm728_vm5, %v721_v27 }
  0xeb PF: > { %s15_s20 = sadd.s32 1, %s967_s20   ;;  %s1095_s18 = smov %s963_s19 }
  0xec   : > { %p12_p5 = scmp.ge.s32.totalorder %s15_s20, 4   ;;  %s1096_s19 = smov %s1098_s21 }
  0xee   :  { %14 = sbr.rel (!%p12_p5) target bundleno = 2 (0x2), region = 80 }

</bundles_post_ra>
